<compile_context>
chip_gen: v7x
topology: tpu7x:2x2x1
jax: 0.10.0
libtpu: 0.0.40
codegen_flags: <defaults>
</compile_context>

<pallas_src>
import functools

import jax
import jax.numpy as jnp
from jax import lax
from jax.experimental import pallas as pl
from jax.experimental.pallas import tpu as pltpu

_LANE = 128      # lane width
_MXU_K = 256     # contraction-dim padding (256^2 MXU on v6e/v7x)


def _round_up(x: int, m: int) -> int:
    return ((x + m - 1) // m) * m


def _probe_buffered1() -> bool:
    """Does this jax support pipeline_mode=pl.Buffered(1) on BlockSpec?"""
    try:
        pl.BlockSpec((8, 128), lambda i: (0, 0), pipeline_mode=pl.Buffered(1))
        return True
    except Exception:
        return False


_HAS_BUFFERED1 = _probe_buffered1()


def _weight_spec(shape, index_map, single_buffer: bool):
    if single_buffer and _HAS_BUFFERED1:
        # constant block index -> one resident copy is enough
        return pl.BlockSpec(shape, index_map, pipeline_mode=pl.Buffered(1))
    # fallback / split-K path: default double buffering (accounted for in the
    # VMEM budget below).
    return pl.BlockSpec(shape, index_map)


def _moe_kernel(x_ref, w_ref, out_ref, acc_ref, *, num_experts: int,
                top_k: int, out_channels: int, c_stride: int, n_out: int):
    E, C, Cp = num_experts, out_channels, c_stride
    k = pl.program_id(1)

    @pl.when(k == 0)
    def _():
        acc_ref[...] = jnp.zeros_like(acc_ref)

    # One fused lane-dense MXU matmul per (seq-tile, K-slice); f32 accumulation
    # in VMEM scratch.  Columns = [experts (E*Cp) | shared (Cp) | gate (E) |
    # shared_gate (1) | pad].
    acc_ref[...] += jnp.dot(x_ref[...], w_ref[...],
                            preferred_element_type=jnp.float32)

    @pl.when(k == pl.num_programs(1) - 1)
    def _():
        y = acc_ref[...]                                      # (TS, n_f) f32
        ec = E * Cp
        logits = y[:, ec + Cp: ec + Cp + E]                   # (TS, E)
        g_logit = y[:, ec + Cp + E: ec + Cp + E + 1]          # (TS, 1)

        # softmax over experts in f32 (torch: F.softmax(..., dtype=float));
        # denominator via the otherwise-idle EUP reciprocal.
        m = jnp.max(logits, axis=-1, keepdims=True)
        ex = jnp.exp(logits - m)
        probs = ex * pl.reciprocal(jnp.sum(ex, axis=-1, keepdims=True),
                                   approx=True)

        # iterative top-k mask (lowest index wins ties, like torch.topk);
        # norm_topk_prob is False in the module -> no renormalization.
        iota_e = lax.broadcasted_iota(jnp.int32, probs.shape, 1)
        mask = jnp.zeros(probs.shape, dtype=jnp.bool_)
        remaining = probs
        for _ in range(top_k):
            cur_max = jnp.max(remaining, axis=-1, keepdims=True)
            idx = jnp.min(jnp.where(remaining == cur_max, iota_e, E),
                          axis=-1, keepdims=True)
            onehot = iota_e == idx
            mask = jnp.logical_or(mask, onehot)
            remaining = jnp.where(onehot, -jnp.inf, remaining)

        # routing weights: single round-trip through the hidden dtype to match
        # torch's routing_weights.to(hidden_states.dtype).
        rw = jnp.where(mask, probs, 0.0).astype(out_ref.dtype).astype(jnp.float32)

        # shared expert with sigmoid gate (EUP exp + approx reciprocal)
        gate = pl.reciprocal(1.0 + jnp.exp(-g_logit), approx=True)     # (TS, 1)
        acc = gate * jnp.maximum(y[:, ec:ec + C], 0.0)                 # (TS, C)

        # routed combine: ReLU fused into the short unrolled weighted sum over
        # experts (no relu_y temporary, no per-expert matmuls).
        for e in range(E):
            acc = acc + rw[:, e:e + 1] * jnp.maximum(y[:, e * Cp:e * Cp + C], 0.0)

        # single lane-dense unmasked store: [final (C) | router_logits (E) | 0 pad]
        parts = [acc, logits]
        pad = n_out - (C + E)
        if pad:
            parts.append(jnp.zeros((acc.shape[0], pad), jnp.float32))
        out_ref[...] = jnp.concatenate(parts, axis=1).astype(out_ref.dtype)


def make_gcn_moe_forward(gate_w, expert_w, shared_w, shared_gate_w, *,
                         top_k: int, compute_dtype=None, tile_s=None):
    """Fuse/pad the weights ONCE and return a jitted forward(hidden_states)."""
    E, H, C = expert_w.shape
    dt = jnp.dtype(compute_dtype) if compute_dtype is not None \
        else jnp.dtype(expert_w.dtype)
    bytes_el = dt.itemsize

    # ---- lane layout: per-expert stride (aligned when padding is cheap) ----
    cpad = _round_up(C, _LANE)
    c_stride = cpad if (cpad == C or (C >= _LANE and cpad - C <= C // 4)) else C

    # ---- fuse all weights into one lane-dense matrix (HOISTED, runs once) ----
    w_exp = jnp.transpose(expert_w, (1, 0, 2))                  # (H, E, C)
    w_sh = shared_w
    if c_stride != C:
        w_exp = jnp.pad(w_exp, ((0, 0), (0, 0), (0, c_stride - C)))
        w_sh = jnp.pad(w_sh, ((0, 0), (0, c_stride - C)))
    w_exp = w_exp.reshape(H, E * c_stride)
    w_fused = jnp.concatenate([w_exp, w_sh, gate_w, shared_gate_w],
                              axis=1).astype(dt)                # (H, n_raw)
    n_raw = w_fused.shape[1]
    n_f = _round_up(n_raw, _LANE)

    # ---- VMEM budget (0.6x capacity; v7x fallback 64 MiB) ----
    try:
        vmem_cap = int(pltpu.get_tpu_info().vmem_capacity_bytes)
    except Exception:
        vmem_cap = 64 * 1024 * 1024
    budget = max(32 * 1024 * 1024, int(0.6 * vmem_cap))

    # ---- contraction (H) padding / split ----
    h_pad = _round_up(H, _MXU_K)
    w_bufs_whole = 1 if _HAS_BUFFERED1 else 2
    hk = h_pad
    if w_bufs_whole * h_pad * n_f * bytes_el > budget // 2:
        # weight does not fit resident -> split H over an 'arbitrary' grid axis
        while hk > _MXU_K and 2 * hk * n_f * bytes_el > budget // 2:
            hk = _round_up(hk // 2, _MXU_K)
        h_pad = _round_up(h_pad, hk)
    n_k = h_pad // hk
    weight_vmem = (w_bufs_whole if n_k == 1 else 2) * hk * n_f * bytes_el

    w_fused = jnp.pad(w_fused, ((0, h_pad - H), (0, n_f - n_raw)))   # (h_pad, n_f)

    n_out = _round_up(C + E, _LANE)
    sub = 8 * max(1, 4 // bytes_el)                 # sublane multiple per dtype
    tile_target = tile_s if tile_s is not None else \
        (512 if vmem_cap >= 100 * 1024 * 1024 else 256)

    def _vmem_need(t):
        return (weight_vmem                       # resident fused weight block
                + t * n_f * 4                     # f32 y-accumulator scratch
                + 2 * t * hk * bytes_el           # double-buffered x block
                + 2 * t * n_out * bytes_el)       # double-buffered output slab

    kernel = functools.partial(_moe_kernel, num_experts=E, top_k=top_k,
                               out_channels=C, c_stride=c_stride, n_out=n_out)

    # TODO(synk): for very large expert counts, add a scalar-prefetched
    # "expert present in tile" table so tiles skip experts no token selected;
    # dense all-experts compute is the right trade-off for small E.

    @jax.jit
    def forward(hidden_states):
        S, h_in = hidden_states.shape
        assert h_in == H, "hidden dim mismatch"
        x = hidden_states.astype(dt)

        # sequence tile: large, sublane-aligned, >=2 grid steps when S allows,
        # shrunk until the per-step VMEM estimate fits the budget.
        tile = max(sub, min(_round_up(tile_target, sub),
                            _round_up(pl.cdiv(S, 2), sub)))
        while tile > sub and _vmem_need(tile) > budget:
            tile = _round_up(tile // 2, sub)

        s_pad = _round_up(S, tile)
        n_s = s_pad // tile
        if n_s > 1 and n_s % 2 == 1:
            # even step count on the 'parallel' axis -> balanced v7x megacore
            # split (one extra zero tile, harmless on 1-TC chips).
            s_pad += tile
            n_s += 1

        pads = ((0, s_pad - S), (0, h_pad - H))
        if pads != ((0, 0), (0, 0)):
            x = jnp.pad(x, pads)        # zero rows/cols are harmless, sliced off

        out = pl.pallas_call(
            kernel,
            out_shape=jax.ShapeDtypeStruct((s_pad, n_out), dt),
            grid_spec=pltpu.PrefetchScalarGridSpec(
                num_scalar_prefetch=0,
                grid=(n_s, n_k),
                in_specs=[
                    pl.BlockSpec((tile, hk), lambda i, k: (i, k)),
                    _weight_spec((hk, n_f), lambda i, k: (k, 0),
                                 single_buffer=(n_k == 1)),
                ],
                out_specs=pl.BlockSpec((tile, n_out), lambda i, k: (i, 0)),
                scratch_shapes=[pltpu.VMEM((tile, n_f), jnp.float32)],
            ),
            compiler_params=pltpu.CompilerParams(
                dimension_semantics=("parallel", "arbitrary"),
                vmem_limit_bytes=budget,
            ),
        )(x, w_fused)

        return out[:S, :C], out[:S, C:C + E]

    return forward


def _reference(hidden_states, gate_w, expert_w, shared_w, shared_gate_w, top_k):
    """Pure-JAX reference mirroring the torch forward (dense equivalent)."""
    logits = hidden_states @ gate_w                                   # (S, E)
    probs = jax.nn.softmax(logits.astype(jnp.float32), axis=1)
    vals, idxs = lax.top_k(probs, top_k)
    E = gate_w.shape[1]
    onehot = jax.nn.one_hot(idxs, E, dtype=probs.dtype)               # (S, K, E)
    rw = jnp.sum(onehot * vals[..., None], axis=1).astype(hidden_states.dtype)
    expert_out = jnp.maximum(
        jnp.einsum("sh,ehc->sec", hidden_states, expert_w), 0.0)      # (S, E, C)
    final = jnp.einsum("se,sec->sc", rw, expert_out)
    shared = jnp.maximum(hidden_states @ shared_w, 0.0)
    gate = jax.nn.sigmoid(hidden_states @ shared_gate_w)              # (S, 1)
    final = final + gate * shared
    return final.astype(hidden_states.dtype), logits.astype(hidden_states.dtype)


if __name__ == "__main__":
    # Small, module-consistent shapes.
    S, H, C = 16, 32, 16          # sequence_length, in_channels(hidden), out_channels
    E, TOP_K = 4, 2               # args.expert_num, args.topk

    key = jax.random.PRNGKey(0)
    k_x, k_g, k_e, k_s, k_sg = jax.random.split(key, 5)

    hidden_states = jax.random.normal(k_x, (S, H), dtype=jnp.float32)

    # Deterministic glorot-ish init (synthetic weights, no checkpoint).
    def glorot(k, shape):
        fan_in, fan_out = shape[-2], shape[-1]
        scale = jnp.sqrt(2.0 / (fan_in + fan_out))
        return scale * jax.random.normal(k, shape, dtype=jnp.float32)

    gate_w = glorot(k_g, (H, E))              # torch gate.weight.T
    expert_w = glorot(k_e, (E, H, C))         # stacked experts[e].lin.weight.T
    shared_w = glorot(k_s, (H, C))            # shared_expert.lin.weight.T
    shared_gate_w = glorot(k_sg, (H, 1))      # shared_expert_gate.weight.T

    # Weight fusion/padding happens once, here (use compute_dtype=jnp.bfloat16
    # on v6e/v7x for 2x MXU throughput; f32 here for a tight correctness check).
    forward = make_gcn_moe_forward(gate_w, expert_w, shared_w, shared_gate_w,
                                   top_k=TOP_K)

    out, logits = forward(hidden_states)
    jax.block_until_ready((out, logits))

    ref_out, ref_logits = _reference(
        hidden_states, gate_w, expert_w, shared_w, shared_gate_w, TOP_K)

    # Looser tolerance on the final output: the kernel uses the EUP approximate
    # reciprocal for softmax/sigmoid (intentional perf choice).
    assert jnp.allclose(logits, ref_logits, atol=1e-4, rtol=1e-4), "logits mismatch"
    assert jnp.allclose(out, ref_out, atol=5e-3, rtol=5e-3), "final mismatch"

    print("KERNEL_OK")
</pallas_src>

<mosaic_0001>
module attributes {stable_mosaic.version = 11 : i64} {
  func.func @_moe_kernel(%arg0: i32, %arg1: i32, %arg2: memref<8x256xf32, #tpu.memory_space<vmem>>, %arg3: memref<256x128xf32, #tpu.memory_space<vmem>>, %arg4: memref<8x128xf32, #tpu.memory_space<vmem>>, %arg5: memref<8x128xf32, #tpu.memory_space<vmem>>) attributes {dimension_semantics = [#tpu.dimension_semantics<parallel>, #tpu.dimension_semantics<arbitrary>], iteration_bounds = array<i64: 2, 1>, scalar_prefetch = 0 : i64, scratch_operands = 1 : i64, tpu.core_type = #tpu.core_type<tc>, window_params = [{transform_indices = @transform_0, window_bounds = array<i64: 8, 256>}, {pipeline_mode = #tpu.pipeline_mode<synchronous>, transform_indices = @transform_1, window_bounds = array<i64: 256, 128>}, {transform_indices = @transform_2, window_bounds = array<i64: 8, 128>}]} {
    %c0_i32 = arith.constant 0 : i32
    %0 = arith.cmpi eq, %arg1, %c0_i32 : i32
    %1 = arith.extui %0 : i1 to i32
    %c0_i32_0 = arith.constant 0 : i32
    %2 = arith.cmpi ne, %1, %c0_i32_0 : i32
    scf.if %2 {
      %cst_10 = arith.constant 0.000000e+00 : f32
      %12 = vector.broadcast %cst_10 : f32 to vector<8x128xf32>
      %c0_11 = arith.constant 0 : index
      %c0_12 = arith.constant 0 : index
      %13 = vector.load %arg5[%c0_11, %c0_12] : memref<8x128xf32, #tpu.memory_space<vmem>>, vector<8x128xf32>
      tpu.vector_store %arg5[%c0_11, %c0_12], %12 {strides = array<i32>} : memref<8x128xf32, #tpu.memory_space<vmem>>, vector<8x128xf32>,
    } else {
    }
    %c0 = arith.constant 0 : index
    %c0_1 = arith.constant 0 : index
    %3 = vector.load %arg5[%c0, %c0_1] : memref<8x128xf32, #tpu.memory_space<vmem>>, vector<8x128xf32>
    %c0_2 = arith.constant 0 : index
    %c0_3 = arith.constant 0 : index
    %4 = vector.load %arg2[%c0_2, %c0_3] : memref<8x256xf32, #tpu.memory_space<vmem>>, vector<8x256xf32>
    %c0_4 = arith.constant 0 : index
    %c0_5 = arith.constant 0 : index
    %5 = vector.load %arg3[%c0_4, %c0_5] : memref<256x128xf32, #tpu.memory_space<vmem>>, vector<256x128xf32>
    %cst = arith.constant dense<0.000000e+00> : vector<8x128xf32>
    %6 = tpu.matmul %4, %5, %cst {dimension_numbers = #tpu.dot_dimension_numbers<[1], [0], [0], [1], [0, 0, 1, 1], [], []>} : vector<8x256xf32>, vector<256x128xf32>, vector<8x128xf32> -> vector<8x128xf32>
    %7 = arith.addf %3, %6 : vector<8x128xf32>
    %c0_6 = arith.constant 0 : index
    %c0_7 = arith.constant 0 : index
    %8 = vector.load %arg5[%c0_6, %c0_7] : memref<8x128xf32, #tpu.memory_space<vmem>>, vector<8x128xf32>
    tpu.vector_store %arg5[%c0_6, %c0_7], %7 {strides = array<i32>} : memref<8x128xf32, #tpu.memory_space<vmem>>, vector<8x128xf32>,
    %c0_i32_8 = arith.constant 0 : i32
    %9 = arith.cmpi eq, %arg1, %c0_i32_8 : i32
    %10 = arith.extui %9 : i1 to i32
    %c0_i32_9 = arith.constant 0 : i32
    %11 = arith.cmpi ne, %10, %c0_i32_9 : i32
    scf.if %11 {
      %c0_10 = arith.constant 0 : index
      %c0_11 = arith.constant 0 : index
      %12 = vector.load %arg5[%c0_10, %c0_11] : memref<8x128xf32, #tpu.memory_space<vmem>>, vector<8x128xf32>
      %13 = vector.extract_strided_slice %12 {offsets = [0, 80], sizes = [8, 4], strides = [1, 1]} : vector<8x128xf32> to vector<8x4xf32>
      %14 = vector.extract_strided_slice %12 {offsets = [0, 84], sizes = [8, 1], strides = [1, 1]} : vector<8x128xf32> to vector<8x1xf32>
      %cst_12 = arith.constant dense<0xFF800000> : vector<8xf32>
      %15 = vector.multi_reduction <maximumf>, %13, %cst_12 [1] : vector<8x4xf32> to vector<8xf32>
      %16 = vector.shape_cast %15 : vector<8xf32> to vector<8x1xf32>
      %17 = vector.broadcast %16 : vector<8x1xf32> to vector<8x4xf32>
      %18 = arith.subf %13, %17 : vector<8x4xf32>
      %19 = math.exp %18 : vector<8x4xf32>
      %cst_13 = arith.constant dense<0.000000e+00> : vector<8xf32>
      %20 = vector.multi_reduction <add>, %19, %cst_13 [1] : vector<8x4xf32> to vector<8xf32>
      %21 = vector.shape_cast %20 : vector<8xf32> to vector<8x1xf32>
      %22 = tpu.reciprocal %21 {approx = true} : vector<8x1xf32> -> vector<8x1xf32>
      %23 = vector.broadcast %22 : vector<8x1xf32> to vector<8x4xf32>
      %24 = arith.mulf %19, %23 : vector<8x4xf32>
      %25 = tpu.iota {dimensions = array<i32: 1>} : vector<8x4xi32>
      %false = arith.constant false
      %26 = vector.broadcast %false : i1 to vector<8x4xi1>
      %cst_14 = arith.constant dense<0xFF800000> : vector<8xf32>
      %27 = vector.multi_reduction <maximumf>, %24, %cst_14 [1] : vector<8x4xf32> to vector<8xf32>
      %28 = vector.shape_cast %27 : vector<8xf32> to vector<8x1xf32>
      %29 = vector.broadcast %28 : vector<8x1xf32> to vector<8x4xf32>
      %30 = arith.cmpf oeq, %24, %29 : vector<8x4xf32>
      %c4_i32 = arith.constant 4 : i32
      %31 = vector.broadcast %c4_i32 : i32 to vector<8x4xi32>
      %32 = arith.select %30, %25, %31 : vector<8x4xi1>, vector<8x4xi32>
      %cst_15 = arith.constant dense<2147483647> : vector<8xi32>
      %33 = vector.multi_reduction <minsi>, %32, %cst_15 [1] : vector<8x4xi32> to vector<8xi32>
      %34 = vector.shape_cast %33 : vector<8xi32> to vector<8x1xi32>
      %35 = vector.broadcast %34 : vector<8x1xi32> to vector<8x4xi32>
      %36 = arith.cmpi eq, %25, %35 : vector<8x4xi32>
      %37 = arith.ori %26, %36 : vector<8x4xi1>
      %cst_16 = arith.constant 0xFF800000 : f32
      %38 = vector.broadcast %cst_16 : f32 to vector<8x4xf32>
      %39 = arith.select %36, %38, %24 : vector<8x4xi1>, vector<8x4xf32>
      %cst_17 = arith.constant dense<0xFF800000> : vector<8xf32>
      %40 = vector.multi_reduction <maximumf>, %39, %cst_17 [1] : vector<8x4xf32> to vector<8xf32>
      %41 = vector.shape_cast %40 : vector<8xf32> to vector<8x1xf32>
      %42 = vector.broadcast %41 : vector<8x1xf32> to vector<8x4xf32>
      %43 = arith.cmpf oeq, %39, %42 : vector<8x4xf32>
      %c4_i32_18 = arith.constant 4 : i32
      %44 = vector.broadcast %c4_i32_18 : i32 to vector<8x4xi32>
      %45 = arith.select %43, %25, %44 : vector<8x4xi1>, vector<8x4xi32>
      %cst_19 = arith.constant dense<2147483647> : vector<8xi32>
      %46 = vector.multi_reduction <minsi>, %45, %cst_19 [1] : vector<8x4xi32> to vector<8xi32>
      %47 = vector.shape_cast %46 : vector<8xi32> to vector<8x1xi32>
      %48 = vector.broadcast %47 : vector<8x1xi32> to vector<8x4xi32>
      %49 = arith.cmpi eq, %25, %48 : vector<8x4xi32>
      %50 = arith.ori %37, %49 : vector<8x4xi1>
      %cst_20 = arith.constant 0.000000e+00 : f32
      %51 = vector.broadcast %cst_20 : f32 to vector<8x4xf32>
      %52 = arith.select %50, %24, %51 : vector<8x4xi1>, vector<8x4xf32>
      %cst_21 = arith.constant 0.000000e+00 : f32
      %53 = vector.broadcast %cst_21 : f32 to vector<8x1xf32>
      %54 = arith.subf %53, %14 : vector<8x1xf32>
      %55 = math.exp %54 : vector<8x1xf32>
      %cst_22 = arith.constant 1.000000e+00 : f32
      %56 = vector.broadcast %cst_22 : f32 to vector<8x1xf32>
      %57 = arith.addf %56, %55 : vector<8x1xf32>
      %58 = tpu.reciprocal %57 {approx = true} : vector<8x1xf32> -> vector<8x1xf32>
      %59 = vector.extract_strided_slice %12 {offsets = [0, 64], sizes = [8, 16], strides = [1, 1]} : vector<8x128xf32> to vector<8x16xf32>
      %cst_23 = arith.constant 0.000000e+00 : f32
      %60 = vector.broadcast %cst_23 : f32 to vector<8x16xf32>
      %61 = arith.maximumf %59, %60 : vector<8x16xf32>
      %62 = vector.broadcast %58 : vector<8x1xf32> to vector<8x16xf32>
      %63 = arith.mulf %62, %61 : vector<8x16xf32>
      %64 = vector.extract_strided_slice %52 {offsets = [0, 0], sizes = [8, 1], strides = [1, 1]} : vector<8x4xf32> to vector<8x1xf32>
      %65 = vector.extract_strided_slice %12 {offsets = [0, 0], sizes = [8, 16], strides = [1, 1]} : vector<8x128xf32> to vector<8x16xf32>
      %cst_24 = arith.constant 0.000000e+00 : f32
      %66 = vector.broadcast %cst_24 : f32 to vector<8x16xf32>
      %67 = arith.maximumf %65, %66 : vector<8x16xf32>
      %68 = vector.broadcast %64 : vector<8x1xf32> to vector<8x16xf32>
      %69 = arith.mulf %68, %67 : vector<8x16xf32>
      %70 = arith.addf %63, %69 : vector<8x16xf32>
      %71 = vector.extract_strided_slice %52 {offsets = [0, 1], sizes = [8, 1], strides = [1, 1]} : vector<8x4xf32> to vector<8x1xf32>
      %72 = vector.extract_strided_slice %12 {offsets = [0, 16], sizes = [8, 16], strides = [1, 1]} : vector<8x128xf32> to vector<8x16xf32>
      %cst_25 = arith.constant 0.000000e+00 : f32
      %73 = vector.broadcast %cst_25 : f32 to vector<8x16xf32>
      %74 = arith.maximumf %72, %73 : vector<8x16xf32>
      %75 = vector.broadcast %71 : vector<8x1xf32> to vector<8x16xf32>
      %76 = arith.mulf %75, %74 : vector<8x16xf32>
      %77 = arith.addf %70, %76 : vector<8x16xf32>
      %78 = vector.extract_strided_slice %52 {offsets = [0, 2], sizes = [8, 1], strides = [1, 1]} : vector<8x4xf32> to vector<8x1xf32>
      %79 = vector.extract_strided_slice %12 {offsets = [0, 32], sizes = [8, 16], strides = [1, 1]} : vector<8x128xf32> to vector<8x16xf32>
      %cst_26 = arith.constant 0.000000e+00 : f32
      %80 = vector.broadcast %cst_26 : f32 to vector<8x16xf32>
      %81 = arith.maximumf %79, %80 : vector<8x16xf32>
      %82 = vector.broadcast %78 : vector<8x1xf32> to vector<8x16xf32>
      %83 = arith.mulf %82, %81 : vector<8x16xf32>
      %84 = arith.addf %77, %83 : vector<8x16xf32>
      %85 = vector.extract_strided_slice %52 {offsets = [0, 3], sizes = [8, 1], strides = [1, 1]} : vector<8x4xf32> to vector<8x1xf32>
      %86 = vector.extract_strided_slice %12 {offsets = [0, 48], sizes = [8, 16], strides = [1, 1]} : vector<8x128xf32> to vector<8x16xf32>
      %cst_27 = arith.constant 0.000000e+00 : f32
      %87 = vector.broadcast %cst_27 : f32 to vector<8x16xf32>
      %88 = arith.maximumf %86, %87 : vector<8x16xf32>
      %89 = vector.broadcast %85 : vector<8x1xf32> to vector<8x16xf32>
      %90 = arith.mulf %89, %88 : vector<8x16xf32>
      %91 = arith.addf %84, %90 : vector<8x16xf32>
      %cst_28 = arith.constant 0.000000e+00 : f32
      %92 = vector.broadcast %cst_28 : f32 to vector<8x108xf32>
      %93 = tpu.concatenate %91, %13, %92 in 1 : vector<8x16xf32>, vector<8x4xf32>, vector<8x108xf32> -> vector<8x128xf32>
      %c0_29 = arith.constant 0 : index
      %c0_30 = arith.constant 0 : index
      %94 = vector.load %arg4[%c0_29, %c0_30] : memref<8x128xf32, #tpu.memory_space<vmem>>, vector<8x128xf32>
      tpu.vector_store %arg4[%c0_29, %c0_30], %93 {strides = array<i32>} : memref<8x128xf32, #tpu.memory_space<vmem>>, vector<8x128xf32>,
    } else {
    }
    return
  }
  func.func @transform_0(%arg0: i32, %arg1: i32) -> (i32, i32) {
    %c0_i32 = arith.constant 0 : i32
    return %arg0, %arg1 : i32, i32
  }
  func.func @transform_1(%arg0: i32, %arg1: i32) -> (i32, i32) {
    %c0_i32 = arith.constant 0 : i32
    %c0_i32_0 = arith.constant 0 : i32
    return %arg1, %c0_i32 : i32, i32
  }
  func.func @transform_2(%arg0: i32, %arg1: i32) -> (i32, i32) {
    %c0_i32 = arith.constant 0 : i32
    %c0_i32_0 = arith.constant 0 : i32
    return %arg0, %c0_i32 : i32, i32
  }
}

</mosaic_0001>

<bundles_post_ra>
// kernel: forward.1
= control target key start
LH: loop header
LB: loop body
LE: loop exit
PB: predicated region body
PF: predicated region fallthrough
CT: control target
= control target key end

     0   :  { %7 = vsyncpa [#allocation4], 0  ;;  %s753_s9 = smov 0   ;;  %s755_s10 = smov 0   ;;  %s855_s0 = inlined_call_operand.vmem [shape: f32[16,256], index: 0, kind: input, shape index: {}]   ;;  %s856_s1 = inlined_call_operand.hbm [shape: f32[256,128], index: 1, kind: input, shape index: {}]   ;;  %s857_s2 = inlined_call_operand.vmem [shape: f32[16,128], index: 2, kind: output, shape index: {}]  }
   0x1   :  { %s757_s11 = smov 0  }
   0x2 LB: > { %s528_s12 = sadd.s32 4294967295, %s723_s11   ;;  %s25_s13 = sadd.s32 1, %s719_s10  ;;  %s723_s11 = sphi %s757_s11, %s13_s11   ;;  %s719_s10 = sphi %s755_s10, %s867_s10   ;;  %s715_s9 = sphi %s753_s9, %s866_s9  }
   0x3   : > { %p27_p0 = scmp.ge.s32.totalorder %s25_s13, 2  ;;  %p530_p1 = scmp.ge.s32.totalorder %s723_s11, 1 }
   0x4   : > { %p110_p2 = scmp.lt.s32.totalorder %s723_s11, 3  ;;  %p778_p4 = scmp.eq.s32.totalorder %s528_s12, 0 }
   0x5   : > { %s869_s13 = smov (%p27_p0, %s25_s13), 0  ;;  %s725_s16 = smov [#allocation3]  }
   0x6   : > { %p774_p3 = pnand %p530_p1, %p110_p2  ;;  %s125_s17 = sshll.u32 %s725_s16, 4  ;;  %s126_s17 = int_to_ptr.vmem [resolvable:$true] %s125_s17 }
   0x7   : > { %s862_s15 = scalar_select %p778_p4, 1, 0 }
   0x8   : > { %s861_s14 = scalar_select %p774_p3, 1, 0 }
   0x9   : > { %p612_p5 = pneg %p774_p3  ;;  %s669_s21 = scalar_lea.hbm %s856_s1, 4096 }
   0xa   : > { %p670_p7 = scmp.ne.s32.totalorder %s856_s1, %s669_s21  ;;  %p676_p11 = scmp.lt.u32.totalorder %s669_s21, %s856_s1 }
   0xb   : > { %p786_p6 = pnand %p778_p4, %p612_p5 }
   0xd   : > { %p671_p8 = pneg %p786_p6 }
   0xf   : > { %p672_p9 = pnand %p671_p8, %p670_p7 }
  0x11   : > { %p673_p10 = pneg %p672_p9 }
  0x13   : > { %p678_p12 = pnand %p676_p11, %p673_p10 }
  0x15   : > { %681 = shalt.err (!%p678_p12)
}
  0x16   : > { %s682_s26 = scalar_lea.vmem %s126_s17, 4096  ;;  %p690_p2 = scmp.lt.s32.totalorder %s126_s17, %s126_s17 }
  0x17   : > { %p683_p13 = scmp.ne.s32.totalorder %s126_s17, %s682_s26  ;;  %p691_p5 = scmp.lt.s32.totalorder %s682_s26, %s682_s26 }
  0x19   : > { %p685_p0 = pnand %p683_p13, %p671_p8  ;;  %p692_p4 = por %p691_p5, %p690_p2 }
  0x1b   : > { %p686_p1 = pneg %p685_p0 }
  0x1d   : > { %p693_p3 = pnand %p692_p4, %p686_p1 }
  0x1f   : > { %696 = shalt.err (!%p693_p3)
}
  0x20   : > { %s726_s27 = smov 128   ;;  %s727_s28 = smov 8  }
  0x21   : > { %615 = dma.hbm_to_vmem [thread:$0]  (!%p786_p6), %s856_s1, 4096, %s126_s17, [#allocation4], %s726_s27, %s726_s27, %s727_s28  }
  0x22   : > { %p864_p7 = scmp.ne.s32.totalorder %s861_s14, 0 }
  0x23   : > { %p865_p9 = scmp.ne.s32.totalorder (!%p864_p7), %s862_s15, 0 }
  0x24   : > { %154 = sbr.rel (%p864_p7) target bundleno = 1983 (0x7bf), region = 28 }
  0x2b   : > { %710 = dma.done.wait (%p865_p9), [#allocation4], 4096  }
  0x2c   : > { %712 = vsyncadd (%p865_p9), [#allocation4], 4294963200  ;;  %p180_p3 = scmp.lt.s32.totalorder %s715_s9, 1  ;;  %v218_v0 = vld [vmem:[#allocation3 + $0x80] sm:$0xff]  ;;  %v219_v1 = vld [vmem:[#allocation3 + $0x88] sm:$0xff]  ;;  %vm310_vm0 = vcmask 687744  }
  0x2d   : > { %v202_v2 = vld [vmem:[#allocation3] sm:$0xff]  ;;  %v576_v3 = vpack.c.bf16 %v219_v1, %v218_v0  ;;  %v203_v4 = vld [vmem:[#allocation3 + $0x8] sm:$0xff]  ;;  %v220_v5 = vld [vmem:[#allocation3 + $0x90] sm:$0xff]  ;;  %s728_s7 = smov 48   ;;  %vm321_vm1 = vcmask 31744   ;;  %v327_v0 = vlaneseq  ;;  %s729_s8 = smov 80  }
  0x2e   : > { %s871_s9 = smov (!%p180_p3, %s715_s9), 1  ;;  %v221_v6 = vld [vmem:[#allocation3 + $0x98] sm:$0xff]  ;;  %v578_v7 = vpack.c.bf16 %v203_v4, %v202_v2  ;;  %v204_v9 = vld [vmem:[#allocation3 + $0x10] sm:$0xff]  ;;  %v222_v11 = vld [vmem:[#allocation3 + $0xa0] sm:$0xff]  ;;  %s735_s12 = smov 64   ;;  %vm441_vm9 = vcmask 130048  }
  0x2f   : > { %v580_v8 = vpack.c.bf16 %v221_v6, %v220_v5  ;;  %v205_v10 = vld [vmem:[#allocation3 + $0x18] sm:$0xff]  ;;  %577 = vmatprep.subr.bf16.mxu0 %v576_v3  ;;  %v223_v12 = vld [vmem:[#allocation3 + $0xa8] sm:$0xff]  ;;  %s540_s3 = sshll.u32 %s871_s9, 4  ;;  %v206_v15 = vld [vmem:[#allocation3 + $0x20] sm:$0xff]  ;;  %v328_v1 = vand.u32 127, %v327_v0  ;;  %s736_s14 = smov 32  }
  0x30   : > { %579 = vmatpush3.bf16.msra.mxu0 %v578_v7  ;;  %v582_v13 = vpack.c.bf16 %v205_v10, %v204_v9  ;;  %v584_v14 = vpack.c.bf16 %v223_v12, %v222_v11  ;;  %v207_v16 = vld [vmem:[#allocation3 + $0x28] sm:$0xff]  ;;  %v224_v17 = vld [vmem:[#allocation3 + $0xb0] sm:$0xff]  ;;  %v225_v18 = vld [vmem:[#allocation3 + $0xb8] sm:$0xff]  ;;  %s820_s6 = scalar_lea.vmem %s855_s0, %s540_s3  ;;  %s737_s15 = smov 16   ;;  %vm443_vm10 = vcmask 162816  }
  0x31   : > { %581 = vmatprep.subr.bf16.mxu0 %v580_v8  ;;  %v586_v19 = vpack.c.bf16 %v207_v16, %v206_v15  ;;  %v588_v20 = vpack.c.bf16 %v225_v18, %v224_v17  ;;  %v208_v21 = vld [vmem:[#allocation3 + $0x30] sm:$0xff]  ;;  %v209_v22 = vld [vmem:[#allocation3 + $0x38] sm:$0xff]  ;;  %v226_v23 = vld [vmem:[#allocation3 + $0xc0] sm:$0xff]  ;;  %s537_s16 = sshll.u32 %s871_s9, 3 }
  0x32   : > { %v227_v24 = vld [vmem:[#allocation3 + $0xc8] sm:$0xff]  ;;  %v590_v26 = vpack.c.bf16 %v209_v22, %v208_v21  ;;  %v210_v28 = vld [vmem:[#allocation3 + $0x40] sm:$0xff]  ;;  %v228_v30 = vld [vmem:[#allocation3 + $0xd0] sm:$0xff]  ;;  %s193_s19 = scalar_lea.vmem %s857_s2, %s537_s16 }
  0x33   : > { %v201_v25 = vld [vmem:[%s820_s6 + $0x8] sm:$0xff]  ;;  %v592_v27 = vpack.c.bf16 %v227_v24, %v226_v23  ;;  %v229_v31 = vld [vmem:[#allocation3 + $0xd8] sm:$0xff]  ;;  %v212_v34 = vld [vmem:[#allocation3 + $0x50] sm:$0xff] }
  0x34   : > { %583 = vmatpush3.bf16.msra.mxu0 %v582_v13  ;;  %298 = vmatprep.mubr.f32.mxu0 %v201_v25  ;;  %v211_v29 = vld [vmem:[#allocation3 + $0x48] sm:$0xff]  ;;  %v596_v33 = vpack.c.bf16 %v229_v31, %v228_v30  ;;  %v213_v35 = vld [vmem:[#allocation3 + $0x58] sm:$0xff]  ;;  %v230_v36 = vld [vmem:[#allocation3 + $0xe0] sm:$0xff]  ;;  %v731_v30 = vmov 0  }
  0x35   : > { %585 = vmatprep.subr.bf16.mxu0 %v584_v14  ;;  %v594_v32 = vpack.c.bf16 %v211_v29, %v210_v28  ;;  %v231_v37 = vld [vmem:[#allocation3 + $0xe8] sm:$0xff]  ;;  %v598_v38 = vpack.c.bf16 %v213_v35, %v212_v34  ;;  %v214_v40 = vld [vmem:[#allocation3 + $0x60] sm:$0xff]  ;;  %v232_v42 = vld [vmem:[#allocation3 + $0xf0] sm:$0xff]  ;;  %v730_v29 = vmov 1   ;;  %655 = vset.pattern.permute.xlu1 %v731_v30 }
  0x36   : > { %v600_v39 = vpack.c.bf16 %v231_v37, %v230_v36  ;;  %v215_v41 = vld [vmem:[#allocation3 + $0x68] sm:$0xff]  ;;  %v233_v43 = vld [vmem:[#allocation3 + $0xf8] sm:$0xff]  ;;  %v216_v46 = vld [vmem:[#allocation3 + $0x70] sm:$0xff]  ;;  %656 = vset.pattern.permute.xlu0 %v730_v29 }
  0x37   : > { %v602_v44 = vpack.c.bf16 %v215_v41, %v214_v40  ;;  %v604_v45 = vpack.c.bf16 %v233_v43, %v232_v42  ;;  %v217_v47 = vld [vmem:[#allocation3 + $0x78] sm:$0xff]  ;;  %v200_v49 = vld [vmem:[%s820_s6] sm:$0xff]  ;;  %v732_v41 = vmov 2   ;;  %v733_v42 = vmov 3  }
  0x38   : > { %587 = vmatpush3.bf16.msra.mxu0 %v586_v19  ;;  %v606_v48 = vpack.c.bf16 %v217_v47, %v216_v46 }
  0x39   : > { %589 = vmatprep.subr.bf16.mxu0 %v588_v20 }
  0x3c   : > { %591 = vmatpush3.bf16.msra.mxu0 %v590_v26 }
  0x3d   : > { %593 = vmatprep.subr.bf16.mxu0 %v592_v27 }
  0x40   : > { %595 = vmatpush3.bf16.msra.mxu0 %v594_v32 }
  0x41   : > { %597 = vmatprep.subr.bf16.mxu0 %v596_v33 }
  0x44   : > { %599 = vmatpush3.bf16.msra.mxu0 %v598_v38 }
  0x45   : > { %601 = vmatprep.subr.bf16.mxu0 %v600_v39 }
  0x48   : > { %603 = vmatpush3.bf16.msra.mxu0 %v602_v44  ;;  %v734_v44 = vmov 84  }
  0x49   : > { %605 = vmatprep.subr.bf16.mxu0 %v604_v45 }
  0x4c   : > { %607 = vmatpush3.bf16.msra.mxu0 %v606_v48 }
  0x4f   : > { %299 = vmatmul.mubr.f32.vlgmr.msra.gmra.mrb[0].mxu0 %v200_v49 }
 0x122   : > { %v573_v50 = vpop.f32.mrb[0].mxu0 }
 0x123   : > { %v574_v51 = vpop.f32.mrb[1].mxu0 }
 0x124   : > { %v824_v52 = vadd.f32 %v574_v51, %v573_v50 }
 0x126   : > { %v311_v53 = vsel %vm310_vm0, %v824_v52, -inf  ;;  %v380_v31 = vsub.f32 0.0, %v824_v52  ;;  %v385_v45 = vmax.f32 %v824_v52, 0.0 }
 0x127   : > { %312 = vmax.xlane.f32.xlu0 %v311_v53 }
 0x128   : > { %v381_v32 = vmul.f32 1.442695, %v380_v31 }
 0x1b4   : > { %v313_v54 = vpop.xlane.xlu0 %312 }
 0x1b5   : > { %v314_v55 = vsub.f32 %v824_v52, %v313_v54 }
 0x1b7   : > { %v315_v56 = vmul.f32 1.442695, %v314_v55 }
 0x1b9   : > { %661 = vpow2.f32 %v315_v56 }
 0x1c3   : > { %v662_v57 = vpop.eup %661 }
 0x1c4   : > { %318 = vrot.lane.b32.xlu0 %v662_v57, %s728_s7 }
 0x236   : > { %v319_v58 = vpop.permute.xlu0 %318 }
 0x237   : > { %v322_v59 = vsel %vm321_vm1, %v319_v58, 0.0 }
 0x238   : > { %323 = vadd.xlane.f32.xlu1 %v322_v59 }
 0x2c5   : > { %v324_v60 = vpop.xlane.xlu1 %323 }
 0x2c6   : > { %663 = vrcp.f32 %v324_v60 }
 0x2c7   : > { %665 = vpow2.f32 %v381_v32 }
 0x2d0   : > { %v664_v61 = vpop.eup %663 }
 0x2d1   : > { %v326_v62 = vmul.f32 %v664_v61, %v662_v57  ;;  %v666_v34 = vpop.eup %665 }
 0x2d2   : > { %v383_v38 = vadd.f32 1.0, %v666_v34 }
 0x2d3   : > { %v329_v63 = vsel %vm310_vm0, %v326_v62, -inf }
 0x2d4   : > { %330 = vmax.xlane.f32.xlu1 %v329_v63  ;;  %667 = vrcp.f32 %v383_v38 }
 0x2de   : > { %v668_v43 = vpop.eup %667 }
 0x2e5   : > { %333 = vrot.lane.b32.xlu1 %v328_v1, %s729_s8 }
 0x361   : > { %v331_v2 = vpop.xlane.xlu1 %330 }
 0x362   : > { %vm332_vm2 = vcmp.eq.f32.partialorder %v326_v62, %v331_v2 }
 0x365   : > { %v334_v3 = vpop.permute.xlu1 %333 }
 0x366   : > { %v335_v4 = vsel %vm332_vm2, %v334_v3, 4 }
 0x367   : > { %v336_v5 = vsel %vm310_vm0, %v335_v4, 2147483647 }
 0x368   : > { %v338_v6 = vshra.s32 %v336_v5, 16  ;;  %v337_v8 = vand.u32 65535, %v336_v5 }
 0x36a   : > { %v340_v7 = vcvt.s32.f32 %v338_v6  ;;  %v339_v10 = vcvt.s32.f32 %v337_v8 }
 0x36c   : > { %341 = vmin.xlane.f32.xlu1 %v340_v7 }
 0x3f9   : > { %v342_v9 = vpop.xlane.xlu1 %341 }
 0x3fa   : > { %vm343_vm3 = vcmp.eq.f32.partialorder %v340_v7, %v342_v9  ;;  %v348_v12 = vcvt.f32.s32 %v342_v9 }
 0x3fb   : > { %v344_v11 = vsel %vm343_vm3, %v339_v10, inf }
 0x3fc   : > { %345 = vmin.xlane.f32.xlu0 %v344_v11  ;;  %v349_v14 = vshll.u32 %v348_v12, 16 }
 0x412   : > { %353 = vrot.lane.b32.xlu0 %v326_v62, %s728_s7 }
 0x489   : > { %v346_v13 = vpop.xlane.xlu0 %345 }
 0x48a   : > { %v347_v15 = vcvt.f32.s32 %v346_v13 }
 0x48c   : > { %v350_v16 = vadd.s32 %v349_v14, %v347_v15 }
 0x48d   : > { %v354_v17 = vpop.permute.xlu0 %353 }
 0x48e   : > { %vm351_vm4 = vcmp.eq.s32.totalorder %v328_v1, %v350_v16 }
 0x48f   : > { %v356_v18 = vsel %vm351_vm4, -inf, %v354_v17 }
 0x490   : > { %v357_v19 = vsel %vm321_vm1, %v356_v18, -inf }
 0x491   : > { %358 = vmax.xlane.f32.xlu1 %v357_v19 }
 0x51e   : > { %v359_v20 = vpop.xlane.xlu1 %358 }
 0x51f   : > { %vm360_vm5 = vcmp.eq.f32.partialorder %v356_v18, %v359_v20 }
 0x520   : > { %v361_v21 = vsel %vm360_vm5, %v328_v1, 4 }
 0x521   : > { %v362_v22 = vsel %vm321_vm1, %v361_v21, 2147483647 }
 0x522   : > { %v364_v23 = vshra.s32 %v362_v22, 16  ;;  %v363_v25 = vand.u32 65535, %v362_v22 }
 0x524   : > { %v366_v24 = vcvt.s32.f32 %v364_v23  ;;  %v365_v27 = vcvt.s32.f32 %v363_v25 }
 0x526   : > { %367 = vmin.xlane.f32.xlu1 %v366_v24 }
 0x5b3   : > { %v368_v26 = vpop.xlane.xlu1 %367 }
 0x5b4   : > { %vm369_vm6 = vcmp.eq.f32.partialorder %v366_v24, %v368_v26  ;;  %v374_v33 = vcvt.f32.s32 %v368_v26 }
 0x5b5   : > { %v370_v28 = vsel %vm369_vm6, %v365_v27, inf }
 0x5b6   : > { %371 = vmin.xlane.f32.xlu1 %v370_v28  ;;  %v375_v36 = vshll.u32 %v374_v33, 16 }
 0x643   : > { %v372_v35 = vpop.xlane.xlu1 %371 }
 0x644   : > { %v373_v37 = vcvt.f32.s32 %v372_v35 }
 0x646   : > { %v376_v39 = vadd.s32 %v375_v36, %v373_v37 }
 0x648   : > { %vm377_vm7 = vcmp.eq.s32.totalorder %v328_v1, %v376_v39 }
 0x649   : > { %vm378_vm8 = vmor %vm351_vm4, %vm377_vm7 }
 0x64a   : > { %v379_v40 = vsel %vm378_vm8, %v354_v17, 0.0 }
 0x64b   : > { %404 = vperm.xlu0 %656, %v379_v40   ;;  %394 = vperm.xlu1 %655, %v379_v40  }
 0x64f   : > { %657 = vset.pattern.permute.xlu0 %v732_v41  ;;  %658 = vset.pattern.permute.xlu1 %v733_v42 }
 0x650   : > { %414 = vperm.xlu0 %657, %v379_v40   ;;  %424 = vperm.xlu1 %658, %v379_v40  }
 0x654   : > { %659 = vset.pattern.permute.xlu1 %v734_v44  ;;  %660 = vset.pattern.permute.xlu0 %v733_v42 }
 0x655   : > { %388 = vperm.xlu1 %659, %v668_v43  }
 0x6ca   : > { %v405_v46 = vpop.permute.xlu0 %404  ;;  %v395_v47 = vpop.permute.xlu1 %394 }
 0x6cb   : > { %v407_v48 = vmul.f32 %v405_v46, %v385_v45  ;;  %v397_v49 = vmul.f32 %v395_v47, %v385_v45 }
 0x6cd   : > { %409 = vrot.lane.b32.xlu1 %v407_v48, %s728_s7  ;;  %399 = vrot.lane.b32.xlu0 %v397_v49, %s735_s12 }
 0x6cf   : > { %v415_v50 = vpop.permute.xlu0 %414  ;;  %v425_v51 = vpop.permute.xlu1 %424 }
 0x6d0   : > { %v417_v53 = vmul.f32 %v415_v50, %v385_v45  ;;  %v427_v54 = vmul.f32 %v425_v51, %v385_v45 }
 0x6d2   : > { %419 = vrot.lane.b32.xlu0 %v417_v53, %s736_s14  ;;  %429 = vrot.lane.b32.xlu1 %v427_v54, %s737_s15 }
 0x6d4   : > { %v389_v55 = vpop.permute.xlu1 %388 }
 0x6d5   : > { %v391_v56 = vmul.f32 %v389_v55, %v385_v45 }
 0x6d6   : > { %438 = vrot.lane.b32.xlu1 %v824_v52, %s735_s12 }
 0x73f   : > { %v400_v57 = vpop.permute.xlu0 %399  ;;  %v410_v59 = vpop.permute.xlu1 %409 }
 0x740   : > { %v402_v58 = vadd.f32 %v400_v57, %v391_v56 }
 0x742   : > { %v412_v60 = vadd.f32 %v410_v59, %v402_v58 }
 0x744   : > { %v420_v61 = vpop.permute.xlu0 %419  ;;  %v430_v63 = vpop.permute.xlu1 %429 }
 0x745   : > { %v422_v62 = vadd.f32 %v420_v61, %v412_v60 }
 0x747   : > { %v432_v0 = vadd.f32 %v430_v63, %v422_v62 }
 0x748   : > { %v439_v1 = vpop.permute.xlu1 %438 }
 0x749   : > { %434 = vrot.lane.b32.xlu0 %v432_v0, %s735_s12 }
 0x7bb   : > { %v435_v52 = vpop.permute.xlu0 %434 }
 0x7bc   : > { %v442_v2 = vsel %vm441_vm9, %v435_v52, %v439_v1 }
 0x7bd   : > { %v444_v3 = vsel %vm443_vm10, %v442_v2, 0.0 }
 0x7be   : > { %445 = vst [vmem:[%s193_s19] sm:$0xff] %v444_v3 }
 0x7bf PF: > { %s13_s11 = sadd.s32 1, %s723_s11   ;;  %s866_s9 = smov %s719_s10 }
 0x7c0   : > { %p10_p4 = scmp.ge.s32.totalorder %s13_s11, 4   ;;  %s867_s10 = smov %s869_s13 }
 0x7c2   :  { %12 = sbr.rel (!%p10_p4) target bundleno = 2 (0x2), region = 72 }
 0x7c9   :  { %465 = vsyncpa [#allocation4], 1 }
 0x7ca   :  { %467 = vsyncpa [#allocation4 + $0x1], 1 }

</bundles_post_ra>
